<compile_context>
chip_gen: v5e
topology: v5e:2x2
jax: 0.10.0
libtpu: 0.0.40
codegen_flags: <defaults>
</compile_context>

<pallas_src>
import functools

import jax
import jax.numpy as jnp
from jax.experimental import pallas as pl
from jax.experimental.pallas import tpu as pltpu


def _round_up(x, m):
    return ((x + m - 1) // m) * m


# ----------------------------------------------------------------------------
# Pallas kernels
# ----------------------------------------------------------------------------
def _matmul_kernel(a_ref, b_ref, bias_ref, *rest, relu, has_residual):
    if has_residual:
        res_ref, o_ref, acc_ref = rest
    else:
        o_ref, acc_ref = rest
        res_ref = None

    @pl.when(pl.program_id(2) == 0)
    def _():
        acc_ref[...] = jnp.zeros_like(acc_ref)

    # bf16 x bf16 on the MXU, f32 accumulation in VMEM scratch.
    acc_ref[...] += jnp.dot(a_ref[...], b_ref[...],
                            preferred_element_type=jnp.float32)

    @pl.when(pl.program_id(2) == pl.num_programs(2) - 1)
    def _():
        r = acc_ref[...] + bias_ref[...]          # f32 epilogue; bias (1, TN) broadcasts
        if has_residual:
            r = r + res_ref[...].astype(jnp.float32)
        if relu:
            r = jnp.maximum(r, 0.0)
        o_ref[...] = r.astype(o_ref.dtype)


def _matmul_vmem_bytes(TM, TN, TK, has_residual, out_bytes):
    """Rough double-buffered VMEM footprint of one matmul pallas_call."""
    b = (2 * TM * TK * 2        # a blocks (bf16), double buffered
         + 2 * TK * TN * 2      # b blocks (bf16)
         + 2 * TM * TN * out_bytes   # output blocks
         + TM * TN * 4          # f32 accumulator scratch
         + 2 * 1 * TN * 4)      # bias blocks
    if has_residual:
        b += 2 * TM * TN * 2
    return b


def matmul_bias_act(a, b_p, bias_p, n_out, relu, residual=None,
                    out_dtype=jnp.bfloat16):
    """a:(M,Kp) bf16 @ b_p:(Kp,Np) bf16 + bias_p:(1,Np) f32.

    Optional fused residual add + ReLU in the epilogue. b_p / bias_p are pre-padded
    (Kp, Np multiples of 128). Returns (M, n_out)."""
    M, Kp = a.shape
    Kp2, Np = b_p.shape
    assert Kp == Kp2 and Kp % 128 == 0 and Np % 128 == 0
    has_residual = residual is not None
    out_bytes = jnp.dtype(out_dtype).itemsize

    # Tile selection: biggest MXU-friendly tiles that divide the padded dims and
    # stay inside a conservative VMEM budget (fits v7x 64 MiB with headroom).
    budget = 40 * 1024 * 1024
    if M >= 128:
        Mp = _round_up(M, 128)
        TM = next(t for t in (512, 256, 128) if Mp % t == 0)
    else:
        Mp = _round_up(M, 8)
        TM = Mp
    TN = next(t for t in (512, 256, 128) if Np % t == 0)
    tk_cands = [t for t in range(min(Kp, 2048), 0, -128) if Kp % t == 0]
    TK = next((t for t in tk_cands
               if _matmul_vmem_bytes(TM, TN, t, has_residual, out_bytes) <= budget),
              tk_cands[-1])
    while (_matmul_vmem_bytes(TM, TN, TK, has_residual, out_bytes) > budget
           and TM > 128 and TM % 2 == 0 and Mp % (TM // 2) == 0):
        TM //= 2

    a = a.astype(jnp.bfloat16)
    if Mp > M:
        a = jnp.pad(a, ((0, Mp - M), (0, 0)))

    inputs = [a, b_p, bias_p]
    in_specs = [
        pl.BlockSpec((TM, TK), lambda i, j, k: (i, k)),
        pl.BlockSpec((TK, TN), lambda i, j, k: (k, j)),
        pl.BlockSpec((1, TN), lambda i, j, k: (0, j)),
    ]
    if has_residual:
        r = residual.astype(jnp.bfloat16)
        r = jnp.pad(r, ((0, Mp - r.shape[0]), (0, Np - r.shape[1])))
        inputs.append(r)
        in_specs.append(pl.BlockSpec((TM, TN), lambda i, j, k: (i, j)))

    kernel = functools.partial(_matmul_kernel, relu=relu,
                               has_residual=has_residual)
    out = pl.pallas_call(
        kernel,
        out_shape=jax.ShapeDtypeStruct((Mp, Np), out_dtype),
        grid_spec=pltpu.PrefetchScalarGridSpec(
            num_scalar_prefetch=0,
            grid=(Mp // TM, Np // TN, Kp // TK),   # reduction axis last
            in_specs=in_specs,
            out_specs=pl.BlockSpec((TM, TN), lambda i, j, k: (i, j)),
            scratch_shapes=[pltpu.VMEM((TM, TN), jnp.float32)],
        ),
        compiler_params=pltpu.CompilerParams(
            dimension_semantics=("parallel", "parallel", "arbitrary"),
            vmem_limit_bytes=48 * 1024 * 1024),   # safe on v7x (64 MiB) and v5e/v6e
    )(*inputs)
    return out[:M, :n_out]


def _running_max_kernel(*refs):
    o_ref = refs[-1]
    m = refs[0][...]
    for r_ref in refs[1:-1]:
        m = jnp.maximum(m, r_ref[...])
    o_ref[...] = m


def maxpool2d(x, ksize=3, stride=2, padding=1):
    """3x3 / stride-2 max pool: blocked running max over the 9 shifted windows
    (no (9, M, C) stack materialized); lane-dense (rows, OW*C) layout."""
    N, H, W, C = x.shape
    xp = jnp.pad(x, ((0, 0), (padding, padding), (padding, padding), (0, 0)),
                 constant_values=-jnp.inf)
    OH = (H + 2 * padding - ksize) // stride + 1
    OW = (W + 2 * padding - ksize) // stride + 1
    rows, cols = N * OH, OW * C
    wins = [xp[:, kh:kh + stride * OH:stride, kw:kw + stride * OW:stride, :]
            .reshape(rows, cols)
            for kh in range(ksize) for kw in range(ksize)]
    TR = next((t for t in (512, 256, 128, 64, 32, 16, 8) if rows % t == 0), rows)
    out = pl.pallas_call(
        _running_max_kernel,
        out_shape=jax.ShapeDtypeStruct((rows, cols), x.dtype),
        grid=(rows // TR,),
        in_specs=[pl.BlockSpec((TR, cols), lambda i: (i, 0)) for _ in wins],
        out_specs=pl.BlockSpec((TR, cols), lambda i: (i, 0)),
    )(*wins)
    return out.reshape(N, OH, OW, C)


def _avgpool_kernel(x_ref, o_ref):
    o_ref[...] = jnp.mean(x_ref[...].astype(jnp.float32), axis=1, keepdims=True)


def global_avgpool(x):
    N, H, W, C = x.shape
    x2 = x.reshape(N, H * W, C)
    out = pl.pallas_call(
        _avgpool_kernel,
        out_shape=jax.ShapeDtypeStruct((N, 1, C), jnp.float32),
        grid=(N,),
        in_specs=[pl.BlockSpec((1, H * W, C), lambda i: (i, 0, 0))],
        out_specs=pl.BlockSpec((1, 1, C), lambda i: (i, 0, 0)),
    )(x2)
    return out.reshape(N, C)


# ----------------------------------------------------------------------------
# Conv layer: im2col (glue) + Pallas matmul (compute). All strides/kernel sizes
# are static Python ints (never pytree leaves), so jit never traces slice bounds.
# ----------------------------------------------------------------------------
def conv2d(x, w_p, bias_p, kh, kw, cout, stride, padding, relu, residual=None):
    """x: NHWC bf16; w_p: (Kp, Np) bf16 pre-transposed/padded; bias_p: (1, Np) f32."""
    N, H, W, C = x.shape
    Kp = w_p.shape[0]
    if padding:
        x = jnp.pad(x, ((0, 0), (padding, padding), (padding, padding), (0, 0)))
    OH = (H + 2 * padding - kh) // stride + 1
    OW = (W + 2 * padding - kw) // stride + 1
    cols = [x[:, i:i + stride * OH:stride, j:j + stride * OW:stride, :]
            for i in range(kh) for j in range(kw)]
    k_logical = kh * kw * C
    if Kp > k_logical:   # fold K padding into the im2col concat (no extra padded copy)
        cols.append(jnp.zeros((N, OH, OW, Kp - k_logical), x.dtype))
    patches = jnp.concatenate(cols, axis=-1).reshape(N * OH * OW, Kp)
    res2d = residual.reshape(N * OH * OW, cout) if residual is not None else None
    out = matmul_bias_act(patches, w_p, bias_p, n_out=cout, relu=relu,
                          residual=res2d, out_dtype=jnp.bfloat16)
    return out.reshape(N, OH, OW, cout)


# ----------------------------------------------------------------------------
# Deterministic ResNet18 parameters (eval mode; BN folded; weights pre-transposed,
# bf16-cast and padded ONCE here, not per forward).
# ----------------------------------------------------------------------------
def fold_bn(w, gamma, beta, mean, var, eps=1e-5):
    scale = gamma / jnp.sqrt(var + eps)
    return w * scale[:, None, None, None], beta - mean * scale


def prep_conv(w, b):
    """Torch-layout (Cout,Cin,KH,KW) + bias -> padded bf16 matmul weights (Kp,Np)."""
    cout, cin, kh, kw = w.shape
    K = kh * kw * cin
    Kp, Np = _round_up(K, 128), _round_up(cout, 128)
    wmat = jnp.transpose(w, (2, 3, 1, 0)).reshape(K, cout)
    w_p = jnp.zeros((Kp, Np), jnp.bfloat16).at[:K, :cout].set(
        wmat.astype(jnp.bfloat16))
    b_p = jnp.zeros((1, Np), jnp.float32).at[0, :cout].set(b)
    return {"w": w_p, "b": b_p}


def init_conv_bn(key, cout, cin, kh, kw):
    k1, k2, k3, k4, k5 = jax.random.split(key, 5)
    fan_in = cin * kh * kw
    w = jax.random.normal(k1, (cout, cin, kh, kw), jnp.float32) * (2.0 / fan_in) ** 0.5
    gamma = jax.random.uniform(k2, (cout,), jnp.float32, 0.5, 1.5)
    beta = jax.random.normal(k3, (cout,), jnp.float32) * 0.1
    mean = jax.random.normal(k4, (cout,), jnp.float32) * 0.1
    var = jax.random.uniform(k5, (cout,), jnp.float32, 0.5, 1.5)
    return prep_conv(*fold_bn(w, gamma, beta, mean, var))


# Static architecture (never inside the traced pytree -> slice bounds stay static ints).
RESNET18_STAGES = (("layer1", 64, 64, 1), ("layer2", 64, 128, 2),
                   ("layer3", 128, 256, 2), ("layer4", 256, 512, 2))


def init_resnet18_params(key):
    keys = iter(jax.random.split(key, 64))
    params = {"conv1": init_conv_bn(next(keys), 64, 3, 7, 7)}
    for name, cin, cout, stride in RESNET18_STAGES:
        blocks = []
        for b in range(2):
            s = stride if b == 0 else 1
            c_in = cin if b == 0 else cout
            blocks.append({
                "conv1": init_conv_bn(next(keys), cout, c_in, 3, 3),
                "conv2": init_conv_bn(next(keys), cout, cout, 3, 3),
                "downsample": (init_conv_bn(next(keys), cout, c_in, 1, 1)
                               if (s != 1 or c_in != cout) else None),
            })
        params[name] = blocks
    kf1, kf2 = jax.random.split(next(keys))
    fc_w = jax.random.normal(kf1, (1000, 512), jnp.float32) * (1.0 / 512) ** 0.5
    fc_b = jax.random.normal(kf2, (1000,), jnp.float32) * 0.01
    np_fc = _round_up(1000, 128)
    params["fc"] = {
        "w": jnp.zeros((512, np_fc), jnp.bfloat16).at[:, :1000].set(
            fc_w.T.astype(jnp.bfloat16)),
        "b": jnp.zeros((1, np_fc), jnp.float32).at[0, :1000].set(fc_b),
    }
    return params


# ----------------------------------------------------------------------------
# Forward
# ----------------------------------------------------------------------------
def basic_block(x, p, cout, stride):
    identity = x
    out = conv2d(x, p["conv1"]["w"], p["conv1"]["b"], kh=3, kw=3, cout=cout,
                 stride=stride, padding=1, relu=True)
    if p["downsample"] is not None:
        identity = conv2d(x, p["downsample"]["w"], p["downsample"]["b"], kh=1, kw=1,
                          cout=cout, stride=stride, padding=0, relu=False)
    # residual add + ReLU fused into the conv2 matmul epilogue (no extra HBM round trip)
    return conv2d(out, p["conv2"]["w"], p["conv2"]["b"], kh=3, kw=3, cout=cout,
                  stride=1, padding=1, relu=True, residual=identity)


def resnet18_forward(params, x_nhwc):
    x = conv2d(x_nhwc, params["conv1"]["w"], params["conv1"]["b"], kh=7, kw=7,
               cout=64, stride=2, padding=3, relu=True)
    x = maxpool2d(x, ksize=3, stride=2, padding=1)
    for name, _, cout, stride in RESNET18_STAGES:
        for bidx, block in enumerate(params[name]):
            x = basic_block(x, block, cout=cout,
                            stride=stride if bidx == 0 else 1)
    feat = global_avgpool(x)                                   # (N, 512) f32
    logits = matmul_bias_act(feat.astype(jnp.bfloat16), params["fc"]["w"],
                             params["fc"]["b"], n_out=1000, relu=False,
                             out_dtype=jnp.float32)
    return logits                                              # (N, 1000) f32


def add_layer_net_forward(params, x_nchw):
    # th == -1  ->  middle = x  ("pure model"; ColorConstancySolved not applied)
    middle = x_nchw
    x_nhwc = jnp.transpose(middle, (0, 2, 3, 1)).astype(jnp.bfloat16)
    logits = resnet18_forward(params, x_nhwc)
    return logits, middle


# ----------------------------------------------------------------------------
if __name__ == "__main__":
    key = jax.random.PRNGKey(0)
    k_params, k_x = jax.random.split(key)

    params = init_resnet18_params(k_params)
    x = jax.random.normal(k_x, (2, 3, 64, 64), jnp.float32)    # NCHW, like PyTorch

    # sanity check of the Pallas matmul kernel (bf16 MXU operands, f32 accumulate) vs jnp
    a_chk = jax.random.normal(jax.random.PRNGKey(1), (70, 256),
                              jnp.float32).astype(jnp.bfloat16)
    b_chk = jax.random.normal(jax.random.PRNGKey(2), (256, 100), jnp.float32)
    bias_chk = jax.random.normal(jax.random.PRNGKey(3), (100,), jnp.float32)
    b_pad = jnp.zeros((256, 128), jnp.bfloat16).at[:, :100].set(
        b_chk.astype(jnp.bfloat16))
    bias_pad = jnp.zeros((1, 128), jnp.float32).at[0, :100].set(bias_chk)
    got = matmul_bias_act(a_chk, b_pad, bias_pad, n_out=100, relu=True,
                          out_dtype=jnp.float32)
    want = jnp.maximum(
        jnp.dot(a_chk.astype(jnp.float32),
                b_chk.astype(jnp.bfloat16).astype(jnp.float32),
                precision=jax.lax.Precision.HIGHEST) + bias_chk, 0.0)
    assert float(jnp.max(jnp.abs(got - want))) < 5e-2

    fwd = jax.jit(add_layer_net_forward)
    logits, middle = fwd(params, x)
    jax.block_until_ready((logits, middle))

    assert logits.shape == (2, 1000)
    assert middle.shape == (2, 3, 64, 64)
    assert bool(jnp.all(jnp.isfinite(logits)))
    print("KERNEL_OK")
</pallas_src>

<mosaic_0001>
module attributes {stable_mosaic.version = 11 : i64} {
  func.func @_matmul_kernel(%arg0: i32, %arg1: i32, %arg2: i32, %arg3: memref<72x256xbf16, #tpu.memory_space<vmem>>, %arg4: memref<256x128xbf16, #tpu.memory_space<vmem>>, %arg5: memref<1x128xf32, #tpu.memory_space<vmem>>, %arg6: memref<72x128xf32, #tpu.memory_space<vmem>>, %arg7: memref<72x128xf32, #tpu.memory_space<vmem>>) attributes {dimension_semantics = [#tpu.dimension_semantics<parallel>, #tpu.dimension_semantics<parallel>, #tpu.dimension_semantics<arbitrary>], iteration_bounds = array<i64: 1, 1, 1>, scalar_prefetch = 0 : i64, scratch_operands = 1 : i64, tpu.core_type = #tpu.core_type<tc>, window_params = [{transform_indices = @transform_0, window_bounds = array<i64: 72, 256>}, {transform_indices = @transform_1, window_bounds = array<i64: 256, 128>}, {transform_indices = @transform_2, window_bounds = array<i64: 1, 128>}, {transform_indices = @transform_3, window_bounds = array<i64: 72, 128>}]} {
    %c0_i32 = arith.constant 0 : i32
    %0 = arith.cmpi eq, %arg2, %c0_i32 : i32
    %1 = arith.extui %0 : i1 to i32
    %c0_i32_0 = arith.constant 0 : i32
    %2 = arith.cmpi ne, %1, %c0_i32_0 : i32
    scf.if %2 {
      %cst_10 = arith.constant 0.000000e+00 : f32
      %12 = vector.broadcast %cst_10 : f32 to vector<72x128xf32>
      %c0_11 = arith.constant 0 : index
      %c0_12 = arith.constant 0 : index
      %13 = vector.load %arg7[%c0_11, %c0_12] : memref<72x128xf32, #tpu.memory_space<vmem>>, vector<72x128xf32>
      tpu.vector_store %arg7[%c0_11, %c0_12], %12 {strides = array<i32>} : memref<72x128xf32, #tpu.memory_space<vmem>>, vector<72x128xf32>,
    } else {
    }
    %c0 = arith.constant 0 : index
    %c0_1 = arith.constant 0 : index
    %3 = vector.load %arg7[%c0, %c0_1] : memref<72x128xf32, #tpu.memory_space<vmem>>, vector<72x128xf32>
    %c0_2 = arith.constant 0 : index
    %c0_3 = arith.constant 0 : index
    %4 = vector.load %arg3[%c0_2, %c0_3] : memref<72x256xbf16, #tpu.memory_space<vmem>>, vector<72x256xbf16>
    %c0_4 = arith.constant 0 : index
    %c0_5 = arith.constant 0 : index
    %5 = vector.load %arg4[%c0_4, %c0_5] : memref<256x128xbf16, #tpu.memory_space<vmem>>, vector<256x128xbf16>
    %cst = arith.constant dense<0.000000e+00> : vector<72x128xf32>
    %6 = tpu.matmul %4, %5, %cst {dimension_numbers = #tpu.dot_dimension_numbers<[1], [0], [0], [1], [0, 0, 1, 1], [], []>} : vector<72x256xbf16>, vector<256x128xbf16>, vector<72x128xf32> -> vector<72x128xf32>
    %7 = arith.addf %3, %6 : vector<72x128xf32>
    %c0_6 = arith.constant 0 : index
    %c0_7 = arith.constant 0 : index
    %8 = vector.load %arg7[%c0_6, %c0_7] : memref<72x128xf32, #tpu.memory_space<vmem>>, vector<72x128xf32>
    tpu.vector_store %arg7[%c0_6, %c0_7], %7 {strides = array<i32>} : memref<72x128xf32, #tpu.memory_space<vmem>>, vector<72x128xf32>,
    %c0_i32_8 = arith.constant 0 : i32
    %9 = arith.cmpi eq, %arg2, %c0_i32_8 : i32
    %10 = arith.extui %9 : i1 to i32
    %c0_i32_9 = arith.constant 0 : i32
    %11 = arith.cmpi ne, %10, %c0_i32_9 : i32
    scf.if %11 {
      %c0_10 = arith.constant 0 : index
      %c0_11 = arith.constant 0 : index
      %12 = vector.load %arg7[%c0_10, %c0_11] : memref<72x128xf32, #tpu.memory_space<vmem>>, vector<72x128xf32>
      %c0_12 = arith.constant 0 : index
      %c0_13 = arith.constant 0 : index
      %13 = vector.load %arg5[%c0_12, %c0_13] : memref<1x128xf32, #tpu.memory_space<vmem>>, vector<1x128xf32>
      %14 = vector.broadcast %13 : vector<1x128xf32> to vector<72x128xf32>
      %15 = arith.addf %12, %14 : vector<72x128xf32>
      %cst_14 = arith.constant 0.000000e+00 : f32
      %16 = vector.broadcast %cst_14 : f32 to vector<72x128xf32>
      %17 = arith.maximumf %15, %16 : vector<72x128xf32>
      %c0_15 = arith.constant 0 : index
      %c0_16 = arith.constant 0 : index
      %18 = vector.load %arg6[%c0_15, %c0_16] : memref<72x128xf32, #tpu.memory_space<vmem>>, vector<72x128xf32>
      tpu.vector_store %arg6[%c0_15, %c0_16], %17 {strides = array<i32>} : memref<72x128xf32, #tpu.memory_space<vmem>>, vector<72x128xf32>,
    } else {
    }
    return
  }
  func.func @transform_0(%arg0: i32, %arg1: i32, %arg2: i32) -> (i32, i32) {
    %c0_i32 = arith.constant 0 : i32
    return %arg0, %arg2 : i32, i32
  }
  func.func @transform_1(%arg0: i32, %arg1: i32, %arg2: i32) -> (i32, i32) {
    %c0_i32 = arith.constant 0 : i32
    return %arg2, %arg1 : i32, i32
  }
  func.func @transform_2(%arg0: i32, %arg1: i32, %arg2: i32) -> (i32, i32) {
    %c0_i32 = arith.constant 0 : i32
    %c0_i32_0 = arith.constant 0 : i32
    return %c0_i32, %arg1 : i32, i32
  }
  func.func @transform_3(%arg0: i32, %arg1: i32, %arg2: i32) -> (i32, i32) {
    %c0_i32 = arith.constant 0 : i32
    return %arg0, %arg1 : i32, i32
  }
}

</mosaic_0001>

<bundles_post_ra>
// kernel: tpu_custom_call.1
= control target key start
LH: loop header
LB: loop body
LE: loop exit
PB: predicated region body
PF: predicated region fallthrough
CT: control target
= control target key end

     0   :  { %8 = vsyncpa [#allocation4], 0  ;;  %s667_s0 = inlined_call_operand.hbm [shape: bf16[72,256], index: 0, kind: input, shape index: {}]   ;;  %s668_s1 = inlined_call_operand.hbm [shape: bf16[256,128], index: 1, kind: input, shape index: {}]   ;;  %s669_s2 = inlined_call_operand.vmem [shape: f32[1,128], index: 2, kind: input, shape index: {}]   ;;  %s670_s3 = inlined_call_operand.hbm [shape: f32[72,128], index: 3, kind: output, shape index: {}]  }
   0x1   :  { %9 = vsyncpa [#allocation7], 0 }
   0x2   :  { %10 = vsyncpa [#allocation5], 0  ;;  %s15_s14 = sshll.u32 %s667_s0, 4  ;;  %s622_s15 = smov [#allocation3]   ;;  %s16_s14 = int_to_ptr.hbm [resolvable:$true] %s15_s14 }
   0x3   :  { %s17_s16 = sshll.u32 %s622_s15, 4  ;;  %s28_s19 = sshll.u32 %s668_s1, 4  ;;  %s18_s16 = int_to_ptr.vmem [resolvable:$true] %s17_s16  ;;  %s29_s19 = int_to_ptr.hbm [resolvable:$true] %s28_s19 }
   0x4   :  { %s623_s20 = smov 128   ;;  %s624_s21 = smov 8  }
   0x5   :  { %23 = dma.hbm_to_vmem [thread:$0]  %s16_s14, 1152, %s18_s16, [#allocation4], %s623_s20, %s623_s20, %s624_s21  }
   0x6   :  { %s625_s22 = smov [#allocation6]   ;;  %s626_s24 = smov 64  }
   0x7   :  { %s30_s23 = sshll.u32 %s625_s22, 4  ;;  %s627_s0 = smov 4   ;;  %s31_s23 = int_to_ptr.vmem [resolvable:$true] %s30_s23 }
   0x8   :  { %36 = dma.hbm_to_vmem [thread:$0]  %s29_s19, 2048, %s31_s23, [#allocation7], %s626_s24, %s626_s24, %s627_s0  }
   0x9   :  { %616 = dma.done.wait [#allocation4], 1152  }
   0xa   :  { %617 = vsyncadd [#allocation4], 4294966144 }
   0xb   :  { %618 = dma.done.wait [#allocation7], 2048  }
   0xc   :  { %619 = vsyncadd [#allocation7], 4294965248  ;;  %v511_v0 = vld [vmem:[#allocation6 + $0x38] sm:$0xff]  ;;  %v510_v2 = vld [vmem:[#allocation6 + $0x30] sm:$0xff]  ;;  %s386_s29 = sshll.u32 %s670_s3, 4  ;;  %s387_s29 = int_to_ptr.hbm [resolvable:$true] %s386_s29 }
   0xd   :  { %v519_v1 = vld [vmem:[#allocation6 + $0x78] sm:$0xff]  ;;  %253 = vmatpush.bf16.msra.mxu0 %v511_v0  ;;  %520 = vmatpush.bf16.msra.mxu2 %v511_v0  ;;  %v518_v3 = vld [vmem:[#allocation6 + $0x70] sm:$0xff]  ;;  %v509_v4 = vld [vmem:[#allocation6 + $0x28] sm:$0xff] }
   0xe   :  { %286 = vmatpush.bf16.msra.mxu1 %v519_v1  ;;  %528 = vmatpush.bf16.msra.mxu3 %v519_v1  ;;  %v517_v5 = vld [vmem:[#allocation6 + $0x68] sm:$0xff]  ;;  %v508_v6 = vld [vmem:[#allocation6 + $0x20] sm:$0xff]  ;;  %v507_v8 = vld [vmem:[#allocation6 + $0x18] sm:$0xff] }
   0xf   :  { %v516_v7 = vld [vmem:[#allocation6 + $0x60] sm:$0xff]  ;;  %v515_v9 = vld [vmem:[#allocation6 + $0x58] sm:$0xff]  ;;  %v506_v10 = vld [vmem:[#allocation6 + $0x10] sm:$0xff] }
  0x10   :  { %v514_v11 = vld [vmem:[#allocation6 + $0x50] sm:$0xff]  ;;  %v505_v12 = vld [vmem:[#allocation6 + $0x8] sm:$0xff]  ;;  %v504_v14 = vld [vmem:[#allocation6] sm:$0xff] }
  0x11   :  { %254 = vmatpush.bf16.msra.mxu0 %v510_v2  ;;  %521 = vmatpush.bf16.msra.mxu2 %v510_v2  ;;  %v513_v13 = vld [vmem:[#allocation6 + $0x48] sm:$0xff]  ;;  %v512_v15 = vld [vmem:[#allocation6 + $0x40] sm:$0xff]  ;;  %v402_v16 = vld [vmem:[#allocation3] sm:$0xf] }
  0x12   :  { %287 = vmatpush.bf16.msra.mxu1 %v518_v3  ;;  %529 = vmatpush.bf16.msra.mxu3 %v518_v3  ;;  %v497_v17 = vld [vmem:[#allocation3 + $0x4] sm:$0xf0]  ;;  %v418_v18 = vld [vmem:[#allocation3 + $0x20] sm:$0xf]  ;;  %v496_v20 = vld [vmem:[#allocation3 + $0x4] sm:$0xf] }
  0x13   :  { %v501_v19 = vld [vmem:[#allocation3 + $0x24] sm:$0xf0]  ;;  %v404_v21 = vld [vmem:[#allocation3 + $0x8] sm:$0xf0]  ;;  %v502_v22 = vld [vmem:[#allocation3 + $0x34] sm:$0xf]  ;;  %v403_v24 = vor.u32 %v497_v17, %v402_v16 }
  0x14   :  { %v428_v23 = vld [vmem:[#allocation3 + $0x38] sm:$0xf0]  ;;  %v419_v25 = vor.u32 %v501_v19, %v418_v18  ;;  %v407_v26 = vor.u32 %v496_v20, %v404_v21  ;;  %v77_v28 = vld [vmem:[#allocation3 + $0x40] sm:$0xff]  ;;  %v410_v29 = vld [vmem:[#allocation3 + $0x10] sm:$0xf] }
  0x15   :  { %255 = vmatpush.bf16.msra.mxu0 %v509_v4  ;;  %522 = vmatpush.bf16.msra.mxu2 %v509_v4  ;;  %v431_v27 = vor.u32 %v502_v22, %v428_v23  ;;  %v499_v30 = vld [vmem:[#allocation3 + $0x14] sm:$0xf0]  ;;  %v426_v31 = vld [vmem:[#allocation3 + $0x30] sm:$0xf]  ;;  %v136_v33 = vunpack.c.h.b16 %v77_v28  ;;  %v498_v34 = vld [vmem:[#allocation3 + $0x14] sm:$0xf]  ;;  %v135_v40 = vunpack.c.l.b16 %v77_v28 }
  0x16   :  { %288 = vmatpush.bf16.msra.mxu1 %v517_v5  ;;  %530 = vmatpush.bf16.msra.mxu3 %v517_v5  ;;  %v503_v32 = vld [vmem:[#allocation3 + $0x34] sm:$0xf0]  ;;  %v412_v35 = vld [vmem:[#allocation3 + $0x18] sm:$0xf0]  ;;  %v411_v36 = vor.u32 %v499_v30, %v410_v29  ;;  %v500_v41 = vld [vmem:[#allocation3 + $0x24] sm:$0xf] }
  0x17   :  { %v427_v37 = vor.u32 %v503_v32, %v426_v31  ;;  %v415_v38 = vor.u32 %v498_v34, %v412_v35  ;;  %v146_v39 = vpack.c.b16 %v136_v33, %v136_v33  ;;  %v420_v42 = vld [vmem:[#allocation3 + $0x28] sm:$0xf0]  ;;  %v145_v43 = vpack.c.b16 %v135_v40, %v135_v40  ;;  %v543_v46 = vld [vmem:[%s669_s2] ss:$0 sm:$0xff]  ;;  %s628_s2 = smov [#allocation8]  }
  0x18   :  { %v423_v44 = vor.u32 %v500_v41, %v420_v42  ;;  %s384_s26 = sshll.u32 %s628_s2, 4  ;;  %s385_s26 = int_to_ptr.vmem [resolvable:$true] %s384_s26 }
  0x19   :  { %256 = vmatpush.bf16.msra.mxu0 %v508_v6  ;;  %523 = vmatpush.bf16.msra.mxu2 %v508_v6 }
  0x1a   :  { %289 = vmatpush.bf16.msra.mxu1 %v516_v7  ;;  %531 = vmatpush.bf16.msra.mxu3 %v516_v7 }
  0x1d   :  { %257 = vmatpush.bf16.msra.mxu0 %v507_v8  ;;  %524 = vmatpush.bf16.msra.mxu2 %v507_v8 }
  0x1e   :  { %290 = vmatpush.bf16.msra.mxu1 %v515_v9  ;;  %532 = vmatpush.bf16.msra.mxu3 %v515_v9 }
  0x21   :  { %258 = vmatpush.bf16.msra.mxu0 %v506_v10  ;;  %525 = vmatpush.bf16.msra.mxu2 %v506_v10 }
  0x22   :  { %291 = vmatpush.bf16.msra.mxu1 %v514_v11  ;;  %533 = vmatpush.bf16.msra.mxu3 %v514_v11 }
  0x25   :  { %259 = vmatpush.bf16.msra.mxu0 %v505_v12  ;;  %526 = vmatpush.bf16.msra.mxu2 %v505_v12 }
  0x26   :  { %292 = vmatpush.bf16.msra.mxu1 %v513_v13  ;;  %534 = vmatpush.bf16.msra.mxu3 %v513_v13 }
  0x29   :  { %260 = vmatpush.bf16.msra.mxu0 %v504_v14  ;;  %527 = vmatpush.bf16.msra.mxu2 %v504_v14 }
  0x2a   :  { %293 = vmatpush.bf16.msra.mxu1 %v512_v15  ;;  %535 = vmatpush.bf16.msra.mxu3 %v512_v15 }
  0x2c   :  { %261 = vmatmul.bf16.vlgmr.msra.gmra.mxu0 %v403_v24  ;;  %271 = vmatmul.bf16.vlgmr.msra.gmra.mxu2 %v419_v25 }
  0x2d   :  { %294 = vmatmul.bf16.vlgmr.msra.gmra.mxu1 %v407_v26  ;;  %309 = vmatmul.bf16.vlgmr.msra.gmra.mxu3 %v431_v27 }
  0x3c   :  { %266 = vmatmul.bf16.gmra.mxu0 %v411_v36  ;;  %276 = vmatmul.bf16.gmra.mxu2 %v427_v37 }
  0x3d   :  { %299 = vmatmul.bf16.gmra.mxu1 %v415_v38  ;;  %314 = vmatmul.bf16.gmra.mxu3 %v146_v39 }
  0x4c   :  { %281 = vmatmul.bf16.gmra.mxu2 %v145_v43 }
  0x4d   :  { %304 = vmatmul.bf16.gmra.mxu1 %v423_v44 }
  0xa9   :  { %v262_v45 = vpop.f32.mrf.mxu0 }
  0xaa   :  { %v295_v47 = vpop.f32.mrf.mxu1 }
  0xab   :  { %v296_v48 = vadd.f32 %v295_v47, %v262_v45 }
  0xad   :  { %v353_v49 = vadd.f32 %v543_v46, %v296_v48 }
  0xaf   :  { %v362_v50 = vmax.f32 %v353_v49, 0.0  ;;  %v272_v51 = vpop.f32.mrf.mxu2 }
  0xb0   :  { %v310_v52 = vpop.f32.mrf.mxu3 }
  0xb1   :  { %371 = vst [vmem:[#allocation8] sm:$0xff] %v362_v50  ;;  %v264_v53 = vpop.f32.mrf.mxu0 }
  0xb2   :  { %v297_v54 = vpop.f32.mrf.mxu1 }
  0xb3   :  { %v298_v55 = vadd.f32 %v297_v54, %v264_v53 }
  0xb5   :  { %v354_v56 = vadd.f32 %v543_v46, %v298_v55 }
  0xb7   :  { %v363_v57 = vmax.f32 %v354_v56, 0.0  ;;  %v274_v58 = vpop.f32.mrf.mxu2 }
  0xb8   :  { %v312_v59 = vpop.f32.mrf.mxu3 }
  0xb9   :  { %372 = vst [vmem:[#allocation8 + $0x8] sm:$0xff] %v363_v57  ;;  %v267_v60 = vpop.f32.mrf.mxu0 }
  0xba   :  { %v300_v61 = vpop.f32.mrf.mxu1 }
  0xbb   :  { %v301_v62 = vadd.f32 %v300_v61, %v267_v60 }
  0xbd   :  { %v355_v63 = vadd.f32 %v543_v46, %v301_v62 }
  0xbf   :  { %v364_v0 = vmax.f32 %v355_v63, 0.0  ;;  %v277_v1 = vpop.f32.mrf.mxu2 }
  0xc0   :  { %v311_v2 = vadd.f32 %v310_v52, %v277_v1  ;;  %v315_v3 = vpop.f32.mrf.mxu3 }
  0xc1   :  { %373 = vst [vmem:[#allocation8 + $0x10] sm:$0xff] %v364_v0  ;;  %v269_v4 = vpop.f32.mrf.mxu0 }
  0xc2   :  { %v359_v5 = vadd.f32 %v543_v46, %v311_v2  ;;  %v302_v6 = vpop.f32.mrf.mxu1 }
  0xc3   :  { %v303_v7 = vadd.f32 %v302_v6, %v269_v4 }
  0xc4   :  { %v368_v8 = vmax.f32 %v359_v5, 0.0 }
  0xc5   :  { %v356_v9 = vadd.f32 %v543_v46, %v303_v7 }
  0xc6   :  { %377 = vst [vmem:[#allocation8 + $0x30] sm:$0xff] %v368_v8 }
  0xc7   :  { %v365_v10 = vmax.f32 %v356_v9, 0.0  ;;  %v279_v11 = vpop.f32.mrf.mxu2 }
  0xc8   :  { %v313_v12 = vadd.f32 %v312_v59, %v279_v11  ;;  %v317_v13 = vpop.f32.mrf.mxu3 }
  0xc9   :  { %374 = vst [vmem:[#allocation8 + $0x18] sm:$0xff] %v365_v10 }
  0xca   :  { %v360_v14 = vadd.f32 %v543_v46, %v313_v12  ;;  %v305_v15 = vpop.f32.mrf.mxu1 }
  0xcb   :  { %v306_v16 = vadd.f32 %v305_v15, %v272_v51 }
  0xcc   :  { %v369_v17 = vmax.f32 %v360_v14, 0.0 }
  0xcd   :  { %v357_v18 = vadd.f32 %v543_v46, %v306_v16 }
  0xce   :  { %378 = vst [vmem:[#allocation8 + $0x38] sm:$0xff] %v369_v17 }
  0xcf   :  { %v366_v19 = vmax.f32 %v357_v18, 0.0  ;;  %v282_v20 = vpop.f32.mrf.mxu2 }
  0xd0   :  { %v316_v21 = vadd.f32 %v315_v3, %v282_v20 }
  0xd1   :  { %375 = vst [vmem:[#allocation8 + $0x20] sm:$0xff] %v366_v19 }
  0xd2   :  { %v361_v22 = vadd.f32 %v543_v46, %v316_v21  ;;  %v307_v23 = vpop.f32.mrf.mxu1 }
  0xd3   :  { %v308_v24 = vadd.f32 %v307_v23, %v274_v58 }
  0xd4   :  { %v370_v25 = vmax.f32 %v361_v22, 0.0 }
  0xd5   :  { %v358_v26 = vadd.f32 %v543_v46, %v308_v24 }
  0xd6   :  { %379 = vst [vmem:[#allocation8 + $0x40] sm:$0xff] %v370_v25 }
  0xd7   :  { %v367_v27 = vmax.f32 %v358_v26, 0.0  ;;  %v284_v28 = vpop.f32.mrf.mxu2 }
  0xd9   :  { %376 = vst [vmem:[#allocation8 + $0x28] sm:$0xff] %v367_v27 }
  0xda   :  { %392 = dma.vmem_to_hbm [thread:$0]  %s385_s26, 1152, %s387_s29, [#allocation5], %s623_s20, %s623_s20, %s624_s21  }
  0xdb   :  { %620 = dma.done.wait [#allocation5], 1152  }
  0xdc   :  { %621 = vsyncadd [#allocation5], 4294966144 }
  0xdd   :  { %397 = vsyncpa [#allocation4], 1 }
  0xde   :  { %398 = vsyncpa [#allocation7], 1 }
  0xdf   :  { %399 = vsyncpa [#allocation5], 1 }

</bundles_post_ra>
